<compile_context>
chip_gen: v5e
topology: v5e:2x2
jax: 0.10.0
libtpu: 0.0.40
codegen_flags: <defaults>
</compile_context>

<pallas_src>
import functools
import math

import jax
import jax.numpy as jnp
from jax.experimental import pallas as pl
from jax.experimental.pallas import tpu as pltpu


INPUT_DIM = 2
HIDDEN = 32
OUTPUT_DIM = 3

# Packed-parameter slab layout (lane offsets inside p12 / p3).
_W2_OFF = 0                       # p12[:,  0:32]  -> w2 (32, 32)
_W1_OFF = HIDDEN                  # p12[:, 32:34]  -> w1 (32, 2)
_B1_OFF = HIDDEN + INPUT_DIM      # p12[:, 34:35]  -> b1 (32, 1)
_B2_OFF = HIDDEN + INPUT_DIM + 1  # p12[:, 35:36]  -> b2 (32, 1)
_P12_W = HIDDEN + INPUT_DIM + 2   # 36
_P3_W = HIDDEN + 1                # 33: [w3 (3,32) | b3 (3,1)]


def _cdiv(a, b):
    return -(-a // b)


def _round_up(n, m):
    return _cdiv(n, m) * m


def _tile_and_grid(batch, batch_tile):
    """Pick a 128-multiple batch tile and padded extent.

    Prefers >= 2 grid steps (v7x has 2 TensorCores; the "parallel" batch axis
    only shards across them if there are >= 2 steps) while keeping each tile
    <= batch_tile so the per-step footprint stays inside scoped VMEM.
    """
    assert batch_tile >= 128 and batch_tile % 128 == 0
    rows = _round_up(max(batch, 1), 128)
    n_tiles = max(1 if rows < 256 else 2, _cdiv(rows, batch_tile))
    tile = _round_up(_cdiv(rows, n_tiles), 128)
    padded = n_tiles * tile
    return tile, padded


def mlp_kernel(xt_ref, p12_ref, p3_ref, o_ref):
    """One batch tile of the 3-layer MLP; batch rides the 128-wide lane axis."""
    xt = xt_ref[...]                                   # (INPUT_DIM, T)

    p12 = p12_ref[...]                                 # (32, 36)
    w2 = p12[:, _W2_OFF:_W2_OFF + HIDDEN]              # (32, 32)
    w1 = p12[:, _W1_OFF:_W1_OFF + INPUT_DIM]           # (32, 2)
    b1 = p12[:, _B1_OFF:_B1_OFF + 1]                   # (32, 1)
    b2 = p12[:, _B2_OFF:_B2_OFF + 1]                   # (32, 1)
    p3 = p3_ref[...]                                   # (3, 33)
    w3 = p3[:, :HIDDEN]                                # (3, 32)
    b3 = p3[:, HIDDEN:HIDDEN + 1]                      # (3, 1)

    # Layer 1: MACs on the MXU (M=32, K=2); only bias + ReLU on the VPU.
    h1 = jnp.dot(w1, xt, preferred_element_type=jnp.float32)
    h1 = jnp.maximum(h1 + b1, 0.0)                     # (32, T)

    # Layer 2: (32,32) @ (32,T) on the MXU.
    h2 = jnp.dot(w2, h1, preferred_element_type=jnp.float32)
    h2 = jnp.maximum(h2 + b2, 0.0)                     # (32, T)

    # Layer 3: (3,32) @ (32,T); output stays lane-dense (T on lanes).
    out = jnp.dot(w3, h2, preferred_element_type=jnp.float32) + b3
    o_ref[...] = out.astype(o_ref.dtype)               # (3, T)


def _pallas_mlp_fm(xt, params, tile):
    """Core pallas_call on feature-major, tile-padded input xt: (2, padded)."""
    w1, b1, w2, b2, w3, b3 = params
    p12 = jnp.concatenate([w2, w1, b1, b2], axis=1)    # (32, 36)
    p3 = jnp.concatenate([w3, b3], axis=1)             # (3, 33)

    padded = xt.shape[1]
    grid = (padded // tile,)
    const = lambda i: (0, 0)   # params stay VMEM-resident across grid steps

    return pl.pallas_call(
        mlp_kernel,
        out_shape=jax.ShapeDtypeStruct((OUTPUT_DIM, padded), jnp.float32),
        grid=grid,
        in_specs=[
            pl.BlockSpec((INPUT_DIM, tile), lambda i: (0, i)),
            pl.BlockSpec(p12.shape, const),
            pl.BlockSpec(p3.shape, const),
        ],
        out_specs=pl.BlockSpec((OUTPUT_DIM, tile), lambda i: (0, i)),
        compiler_params=pltpu.CompilerParams(
            dimension_semantics=("parallel",),
        ),
    )(xt, p12, p3)


@functools.partial(jax.jit, static_argnames=("batch_tile",))
def _mlp_forward_pallas(x, params, batch_tile):
    """Batch-major wrapper: (batch, 2) -> (batch, 3). Fully jitted so the
    pad/transpose/slice layout plumbing fuses around the kernel."""
    batch = x.shape[0]
    tile, padded = _tile_and_grid(batch, batch_tile)
    xt = jnp.pad(x.astype(jnp.float32).T, ((0, 0), (0, padded - batch)))
    out_t = _pallas_mlp_fm(xt, params, tile)
    return out_t[:, :batch].T


@functools.partial(jax.jit, static_argnames=("batch_tile",))
def mlp_forward_feature_major(xt, params, batch_tile=32768):
    """Feature-major entry: xt is (2, batch), returns (3, batch). Avoids the
    batch-major transpose round-trips entirely for callers that can keep
    this layout."""
    batch = xt.shape[1]
    tile, padded = _tile_and_grid(batch, batch_tile)
    xt_p = jnp.pad(xt.astype(jnp.float32), ((0, 0), (0, padded - batch)))
    return _pallas_mlp_fm(xt_p, params, tile)[:, :batch]


def reference_forward(x, params):
    """Pure-JAX reference (PyTorch semantics: x @ W.T + b)."""
    w1, b1, w2, b2, w3, b3 = params
    h1 = jnp.maximum(x @ w1.T + b1.T, 0.0)
    h2 = jnp.maximum(h1 @ w2.T + b2.T, 0.0)
    return h2 @ w3.T + b3.T


_reference_forward_jit = jax.jit(reference_forward)


def mlp_forward(x, params, *, batch_tile=32768, min_pallas_batch=2048,
                force_pallas=False):
    """Runs the MLP on x of shape (batch, 2), returns (batch, 3)."""
    batch = x.shape[0]
    if batch < min_pallas_batch and not force_pallas:
        # Small-batch dispatch: pallas_call + layout overhead dwarfs the work;
        # XLA's fused GEMM path is faster here.
        return _reference_forward_jit(x, params)
    return _mlp_forward_pallas(x, params, batch_tile)


def xavier_uniform(key, out_features, in_features, gain=1.0):
    """Matches torch.nn.init.xavier_uniform_ on a (out, in) Linear weight."""
    limit = gain * math.sqrt(6.0 / (in_features + out_features))
    return jax.random.uniform(
        key, (out_features, in_features), dtype=jnp.float32,
        minval=-limit, maxval=limit,
    )


def init_params(key):
    k1, k2, k3 = jax.random.split(key, 3)
    w1 = xavier_uniform(k1, HIDDEN, INPUT_DIM)       # (32, 2)
    b1 = jnp.zeros((HIDDEN, 1), jnp.float32)
    w2 = xavier_uniform(k2, HIDDEN, HIDDEN)          # (32, 32)
    b2 = jnp.zeros((HIDDEN, 1), jnp.float32)
    w3 = xavier_uniform(k3, OUTPUT_DIM, HIDDEN)      # (3, 32)
    b3 = jnp.zeros((OUTPUT_DIM, 1), jnp.float32)
    return (w1, b1, w2, b2, w3, b3)


if __name__ == "__main__":
    key = jax.random.PRNGKey(0)
    pkey, xkey1, xkey2 = jax.random.split(key, 3)
    params = init_params(pkey)

    # 1) Small batch, forced through the Pallas kernel (single 128-row tile).
    batch = 8
    x_small = jax.random.normal(xkey1, (batch, INPUT_DIM), dtype=jnp.float32)
    out_small = mlp_forward(x_small, params, force_pallas=True)
    jax.block_until_ready(out_small)
    ref_small = reference_forward(x_small, params)
    assert out_small.shape == (batch, OUTPUT_DIM), out_small.shape
    assert jnp.allclose(out_small, ref_small, atol=1e-4, rtol=1e-4), \
        "small-batch mismatch vs reference"

    # 2) Larger batch: dispatcher takes the Pallas path (2 tiles, so the
    #    "parallel" axis can shard across v7x's two TensorCores).
    x_big = jax.random.normal(xkey2, (4096, INPUT_DIM), dtype=jnp.float32)
    out_big = mlp_forward(x_big, params)
    jax.block_until_ready(out_big)
    ref_big = reference_forward(x_big, params)
    assert out_big.shape == (4096, OUTPUT_DIM), out_big.shape
    assert jnp.allclose(out_big, ref_big, atol=1e-4, rtol=1e-4), \
        "large-batch mismatch vs reference"

    # 3) Small-batch dispatch (pure-JAX fallback) sanity check.
    out_disp = mlp_forward(x_small, params)
    assert jnp.allclose(out_disp, ref_small, atol=1e-5, rtol=1e-5)

    print("KERNEL_OK")
</pallas_src>

<mosaic_0001>
module attributes {stable_mosaic.version = 11 : i64} {
  func.func @mlp_kernel(%arg0: i32, %arg1: memref<2x128xf32, #tpu.memory_space<vmem>>, %arg2: memref<32x36xf32, #tpu.memory_space<vmem>>, %arg3: memref<3x33xf32, #tpu.memory_space<vmem>>, %arg4: memref<3x128xf32, #tpu.memory_space<vmem>>) attributes {dimension_semantics = [#tpu.dimension_semantics<parallel>], iteration_bounds = array<i64: 1>, scalar_prefetch = 0 : i64, scratch_operands = 0 : i64, tpu.core_type = #tpu.core_type<tc>, window_params = [{transform_indices = @transform_0, window_bounds = array<i64: 2, 128>}, {pipeline_mode = #tpu.pipeline_mode<synchronous>, transform_indices = @transform_1, window_bounds = array<i64: 32, 36>}, {pipeline_mode = #tpu.pipeline_mode<synchronous>, transform_indices = @transform_2, window_bounds = array<i64: 3, 33>}, {transform_indices = @transform_3, window_bounds = array<i64: 3, 128>}]} {
    %c0 = arith.constant 0 : index
    %c0_0 = arith.constant 0 : index
    %0 = vector.load %arg1[%c0, %c0_0] : memref<2x128xf32, #tpu.memory_space<vmem>>, vector<2x128xf32>
    %c0_1 = arith.constant 0 : index
    %c0_2 = arith.constant 0 : index
    %1 = vector.load %arg2[%c0_1, %c0_2] : memref<32x36xf32, #tpu.memory_space<vmem>>, vector<32x36xf32>
    %2 = vector.extract_strided_slice %1 {offsets = [0, 0], sizes = [32, 32], strides = [1, 1]} : vector<32x36xf32> to vector<32x32xf32>
    %3 = vector.extract_strided_slice %1 {offsets = [0, 32], sizes = [32, 2], strides = [1, 1]} : vector<32x36xf32> to vector<32x2xf32>
    %4 = vector.extract_strided_slice %1 {offsets = [0, 34], sizes = [32, 1], strides = [1, 1]} : vector<32x36xf32> to vector<32x1xf32>
    %5 = vector.extract_strided_slice %1 {offsets = [0, 35], sizes = [32, 1], strides = [1, 1]} : vector<32x36xf32> to vector<32x1xf32>
    %c0_3 = arith.constant 0 : index
    %c0_4 = arith.constant 0 : index
    %6 = vector.load %arg3[%c0_3, %c0_4] : memref<3x33xf32, #tpu.memory_space<vmem>>, vector<3x33xf32>
    %7 = vector.extract_strided_slice %6 {offsets = [0, 0], sizes = [3, 32], strides = [1, 1]} : vector<3x33xf32> to vector<3x32xf32>
    %8 = vector.extract_strided_slice %6 {offsets = [0, 32], sizes = [3, 1], strides = [1, 1]} : vector<3x33xf32> to vector<3x1xf32>
    %cst = arith.constant dense<0.000000e+00> : vector<32x128xf32>
    %9 = tpu.matmul %3, %0, %cst {dimension_numbers = #tpu.dot_dimension_numbers<[1], [0], [0], [1], [0, 0, 1, 1], [], []>} : vector<32x2xf32>, vector<2x128xf32>, vector<32x128xf32> -> vector<32x128xf32>
    %10 = vector.broadcast %4 : vector<32x1xf32> to vector<32x128xf32>
    %11 = arith.addf %9, %10 : vector<32x128xf32>
    %cst_5 = arith.constant 0.000000e+00 : f32
    %12 = vector.broadcast %cst_5 : f32 to vector<32x128xf32>
    %13 = arith.maximumf %11, %12 : vector<32x128xf32>
    %cst_6 = arith.constant dense<0.000000e+00> : vector<32x128xf32>
    %14 = tpu.matmul %2, %13, %cst_6 {dimension_numbers = #tpu.dot_dimension_numbers<[1], [0], [0], [1], [0, 0, 1, 1], [], []>} : vector<32x32xf32>, vector<32x128xf32>, vector<32x128xf32> -> vector<32x128xf32>
    %15 = vector.broadcast %5 : vector<32x1xf32> to vector<32x128xf32>
    %16 = arith.addf %14, %15 : vector<32x128xf32>
    %cst_7 = arith.constant 0.000000e+00 : f32
    %17 = vector.broadcast %cst_7 : f32 to vector<32x128xf32>
    %18 = arith.maximumf %16, %17 : vector<32x128xf32>
    %cst_8 = arith.constant dense<0.000000e+00> : vector<3x128xf32>
    %19 = tpu.matmul %7, %18, %cst_8 {dimension_numbers = #tpu.dot_dimension_numbers<[1], [0], [0], [1], [0, 0, 1, 1], [], []>} : vector<3x32xf32>, vector<32x128xf32>, vector<3x128xf32> -> vector<3x128xf32>
    %20 = vector.broadcast %8 : vector<3x1xf32> to vector<3x128xf32>
    %21 = arith.addf %19, %20 : vector<3x128xf32>
    %c0_9 = arith.constant 0 : index
    %c0_10 = arith.constant 0 : index
    %22 = vector.load %arg4[%c0_9, %c0_10] : memref<3x128xf32, #tpu.memory_space<vmem>>, vector<3x128xf32>
    tpu.vector_store %arg4[%c0_9, %c0_10], %21 {strides = array<i32>} : memref<3x128xf32, #tpu.memory_space<vmem>>, vector<3x128xf32>,
    return
  }
  func.func @transform_0(%arg0: i32) -> (i32, i32) {
    %c0_i32 = arith.constant 0 : i32
    %c0_i32_0 = arith.constant 0 : i32
    return %c0_i32, %arg0 : i32, i32
  }
  func.func @transform_1(%arg0: i32) -> (i32, i32) {
    %c0_i32 = arith.constant 0 : i32
    %c0_i32_0 = arith.constant 0 : i32
    %c0_i32_1 = arith.constant 0 : i32
    return %c0_i32, %c0_i32_0 : i32, i32
  }
  func.func @transform_2(%arg0: i32) -> (i32, i32) {
    %c0_i32 = arith.constant 0 : i32
    %c0_i32_0 = arith.constant 0 : i32
    %c0_i32_1 = arith.constant 0 : i32
    return %c0_i32, %c0_i32_0 : i32, i32
  }
  func.func @transform_3(%arg0: i32) -> (i32, i32) {
    %c0_i32 = arith.constant 0 : i32
    %c0_i32_0 = arith.constant 0 : i32
    return %c0_i32, %arg0 : i32, i32
  }
}

</mosaic_0001>

<bundles_post_ra>
// kernel: _mlp_forward_pallas.1
= control target key start
LH: loop header
LB: loop body
LE: loop exit
PB: predicated region body
PF: predicated region fallthrough
CT: control target
= control target key end

     0   :  { %s211_s16 = smov 96   ;;  %vm57_vm0 = vcmask 1041408   ;;  %v212_v5 = vmov 34   ;;  %vm48_vm1 = vcmask 15360   ;;  %v213_v11 = vmov 35   ;;  %s273_s1 = inlined_call_operand.vmem [shape: f32[32,36], index: 1, kind: input, shape index: {}]   ;;  %s274_s0 = inlined_call_operand.vmem [shape: f32[2,128], index: 0, kind: input, shape index: {}]   ;;  %s275_s2 = inlined_call_operand.vmem [shape: f32[3,33], index: 2, kind: input, shape index: {}]   ;;  %s276_s3 = inlined_call_operand.vmem [shape: f32[3,128], index: 3, kind: output, shape index: {}]  }
   0x1   :  { %v238_v0 = vld [vmem:[%s273_s1] sm:$0xff]  ;;  %v243_v1 = vld [vmem:[%s273_s1 + $0x18] sm:$0xff]  ;;  %v16_v2 = vld [vmem:[%s273_s1 + $0x8] sm:$0xff]  ;;  %205 = vset.pattern.permute.xlu1 %v212_v5  ;;  %204 = vset.pattern.permute.xlu0 %v212_v5  ;;  %vm110_vm2 = vcmask 261120   ;;  %v214_v28 = vmov 32  }
   0x2   :  { %40 = vrot.lane.b32.xlu0 %v238_v0, %s211_s16  ;;  %46 = vrot.lane.b32.xlu1 %v243_v1, %s211_s16  ;;  %v17_v3 = vld [vmem:[%s273_s1 + $0x10] sm:$0xff]  ;;  %v14_v4 = vld [vmem:[%s274_s0] sm:$0x3] }
   0x3   :  { %184 = vmatpush.msk.msra.mxu0 %vm57_vm0, %v14_v4  ;;  %194 = vmatpush.msk.msra.mxu2 %vm57_vm0, %v14_v4  ;;  %v19_v27 = vld [vmem:[%s275_s2] sm:$0x7] }
   0x4   :  { %203 = vset.pattern.permute.xlu2 %v212_v5 }
   0x5   :  { %37 = vperm.xlu2 %203, %v243_v1  }
   0xa   :  { %42 = vrot.lane.b32.xlu0 %v16_v2, %s211_s16  ;;  %44 = vrot.lane.b32.xlu1 %v17_v3, %s211_s16 }
   0xd   :  { %32 = vperm.xlu2 %203, %v17_v3  }
  0x12   :  { %22 = vperm.xlu1 %205, %v238_v0   ;;  %27 = vperm.xlu0 %204, %v16_v2  }
  0x15   :  { %206 = vset.pattern.permute.xlu2 %v213_v11 }
  0x16   :  { %107 = vperm.xlu2 %206, %v243_v1  }
  0x1a   :  { %207 = vset.pattern.permute.xlu1 %v213_v11  ;;  %208 = vset.pattern.permute.xlu0 %v213_v11 }
  0x1b   :  { %103 = vperm.xlu1 %207, %v17_v3   ;;  %95 = vperm.xlu0 %208, %v238_v0  }
  0x1e   :  { %99 = vperm.xlu2 %206, %v16_v2  }
  0x23   :  { %209 = vset.pattern.permute.xlu1 %v214_v28  ;;  %210 = vset.pattern.permute.xlu0 %v214_v28 }
  0x24   :  { %154 = vperm.xlu1 %209, %v19_v27  }
  0x5f   :  { %v38_v12 = vpop.permute.xlu2 %37 }
  0x67   :  { %v33_v19 = vpop.permute.xlu2 %32 }
  0x70   :  { %v108_v29 = vpop.permute.xlu2 %107 }
  0x74   :  { %v41_v6 = vpop.permute.xlu0 %40  ;;  %v47_v7 = vpop.permute.xlu1 %46 }
  0x75   :  { %185 = vmatmul.msk.f32.vlgmr.msra.gmra.mxu0 %vm48_vm1, %v41_v6  ;;  %188 = vmatmul.msk.f32.vlgmr.msra.gmra.mxu2 %vm48_vm1, %v47_v7 }
  0x78   :  { %v100_v33 = vpop.permute.xlu2 %99 }
  0x7c   :  { %v43_v8 = vpop.permute.xlu0 %42  ;;  %v45_v9 = vpop.permute.xlu1 %44 }
  0x7d   :  { %186 = vmatmul.msk.f32.gmra.mxu0 %vm48_vm1, %v43_v8 }
  0x84   :  { %v28_v17 = vpop.permute.xlu0 %27  ;;  %v23_v18 = vpop.permute.xlu1 %22 }
  0x85   :  { %187 = vmatmul.msk.f32.gmra.mxu0 %vm48_vm1, %v45_v9 }
  0x8d   :  { %v104_v32 = vpop.permute.xlu1 %103  ;;  %v96_v38 = vpop.permute.xlu0 %95 }
  0x96   :  { %v155_v45 = vpop.permute.xlu1 %154 }
  0xf2   :  { %v78_v10 = vpop.f32.mrf.mxu0 }
  0xf3   :  { %v79_v23 = vadd.f32 %v78_v10, %v23_v18 }
  0xf5   :  { %v90_v26 = vmax.f32 %v79_v23, 0.0 }
  0xf8   :  { %v87_v13 = vpop.f32.mrf.mxu2 }
  0xf9   :  { %v88_v14 = vadd.f32 %v87_v13, %v38_v12 }
  0xfa   :  { %v81_v15 = vpop.f32.mrf.mxu0 }
  0xfb   :  { %v93_v16 = vmax.f32 %v88_v14, 0.0  ;;  %v82_v21 = vadd.f32 %v81_v15, %v28_v17 }
  0xfd   :  { %131 = vmatpush.msra.mxu1 %v93_v16  ;;  %195 = vmatpush.msra.mxu3 %v93_v16  ;;  %v91_v25 = vmax.f32 %v82_v21, 0.0 }
 0x102   :  { %v84_v20 = vpop.f32.mrf.mxu0 }
 0x103   :  { %v85_v22 = vadd.f32 %v84_v20, %v33_v19 }
 0x105   :  { %v92_v24 = vmax.f32 %v85_v22, 0.0 }
 0x107   :  { %132 = vmatpush.msra.mxu1 %v92_v24  ;;  %196 = vmatpush.msra.mxu3 %v92_v24 }
 0x109   :  { %133 = vmatpush.msra.mxu1 %v91_v25  ;;  %197 = vmatpush.msra.mxu3 %v91_v25 }
 0x10b   :  { %134 = vmatpush.msra.mxu1 %v90_v26  ;;  %198 = vmatpush.msra.mxu3 %v90_v26 }
 0x10c   :  { %191 = vmatmul.msk.f32.vlgmr.msra.gmra.mxu3 %vm110_vm2, %v17_v3  ;;  %189 = vmatmul.msk.f32.vlgmr.msra.gmra.mxu1 %vm110_vm2, %v238_v0 }
 0x114   :  { %192 = vmatmul.msk.f32.gmra.mxu3 %vm110_vm2, %v243_v1  ;;  %190 = vmatmul.msk.f32.gmra.mxu1 %vm110_vm2, %v16_v2 }
 0x189   :  { %v136_v30 = vpop.f32.mrf.mxu1 }
 0x18a   :  { %v137_v42 = vadd.f32 %v136_v30, %v96_v38 }
 0x18c   :  { %v148_v44 = vmax.f32 %v137_v42, 0.0 }
 0x18f   :  { %v142_v31 = vpop.f32.mrf.mxu3 }
 0x190   :  { %v143_v36 = vadd.f32 %v142_v31, %v104_v32 }
 0x191   :  { %v139_v34 = vpop.f32.mrf.mxu1 }
 0x192   :  { %v140_v39 = vadd.f32 %v139_v34, %v100_v33  ;;  %v150_v41 = vmax.f32 %v143_v36, 0.0 }
 0x194   :  { %v149_v43 = vmax.f32 %v140_v39, 0.0 }
 0x197   :  { %v145_v35 = vpop.f32.mrf.mxu3 }
 0x198   :  { %v146_v37 = vadd.f32 %v145_v35, %v108_v29 }
 0x19a   :  { %v151_v40 = vmax.f32 %v146_v37, 0.0 }
 0x19c   :  { %171 = vmatpush.msrb.mxu2 %v151_v40 }
 0x19e   :  { %172 = vmatpush.msrb.mxu2 %v150_v41 }
 0x1a0   :  { %173 = vmatpush.msrb.mxu2 %v149_v43 }
 0x1a2   :  { %174 = vmatpush.msrb.mxu2 %v148_v44 }
 0x1a3   :  { %193 = vmatmul.msk.f32.vlgmr.msrb.gmra.mxu2 %vm110_vm2, %v19_v27 }
 0x226   :  { %v176_v46 = vpop.f32.mrf.mxu2 }
 0x227   :  { %v177_v47 = vadd.f32 %v176_v46, %v155_v45 }
 0x229   :  { %179 = vst [vmem:[%s276_s3] sm:$0x7] %v177_v47 }

</bundles_post_ra>
